<compile_context>
chip_gen: v6e
topology: v6e:2x2x1
jax: 0.10.0
libtpu: 0.0.40
codegen_flags: <defaults>
</compile_context>

<pallas_src>
import math

import jax
import jax.numpy as jnp
from jax.experimental import pallas as pl
from jax.experimental.pallas import tpu as pltpu

# ----------------------------- configuration --------------------------------
SEQ = 16            # sequence_length
BATCH = 8           # batch_size  (Conv1d channel dim)
NUM_TOKENS = 12
NUM_LAYERS = 2
NUM_INPUTS = 80     # chosen so the length after conv3 is exactly 36 (Linear(36, .))

K1 = SEQ // 4 + 1           # 5   conv1 kernel
P1K = SEQ // 16 + 1         # 2   pool1 kernel == stride
P2K = SEQ // 32 + 1         # 1   pool2 kernel == stride (identity)
K3 = 3                      # conv3 kernel
CO1, CO2, CO3 = BATCH // 2, BATCH // 4, BATCH

L1 = NUM_INPUTS - K1 + 1    # 76
L2 = L1 // P1K              # 38
L3 = L2 // P2K              # 38
L4 = L3 - K3 + 1            # 36  == Linear in_features
assert L4 == 36, "config must keep Linear(36, num_tokens) consistent"
assert CO3 == BATCH

FLAT_IN = BATCH * NUM_INPUTS        # 640
FLAT_OUT = NUM_TOKENS * BATCH       # 96 (token-major: lane = t*BATCH + channel)
BN_EPS = 1e-5


# ------------------------------- Pallas kernel -------------------------------
def generator_kernel(x_ref, a_ref, b_ref, out_ref):
    x = x_ref[...]                                     # (SEQ, FLAT_IN) f32

    # BatchNorm1d(seq_len) x NUM_LAYERS, train mode, affine = identity.
    # Stats for seq position n are over its whole (batch, num_inputs) row.
    # Fused: after the first normalization the row mean is exactly 0, so every
    # further layer only rescales -> one subtract + one multiply over the tile.
    m = jnp.mean(x, axis=1, keepdims=True)             # (SEQ, 1)
    d = x - m
    v = jnp.mean(d * d, axis=1, keepdims=True)         # biased variance (PyTorch)
    scale = jax.lax.rsqrt(v + BN_EPS)
    for _ in range(NUM_LAYERS - 1):
        v = v * (scale * scale)                        # variance after previous layer
        scale = scale * jax.lax.rsqrt(v + BN_EPS)
    xn = d * scale                                     # (SEQ, FLAT_IN)

    # Entire post-BN chain (conv1∘pool1∘conv2∘pool2∘conv3∘linear) pre-composed
    # into one matrix: a single MXU matmul with K = FLAT_IN.
    logits = jnp.dot(xn, a_ref[...],
                     preferred_element_type=jnp.float32) + b_ref[...]   # (SEQ, 96)
    # lane layout of logits: l = token * BATCH + batch_channel (token-major).

    # First-max-wins argmax over tokens: elementwise compares on (SEQ, BATCH)
    # slices (strict '>' preserves the earliest index on ties, like the Python loop).
    best = logits[:, 0:BATCH]
    idx = jnp.zeros((SEQ, BATCH), jnp.int32)
    for t in range(1, NUM_TOKENS):
        cur = logits[:, t * BATCH:(t + 1) * BATCH]
        take = cur > best
        idx = jnp.where(take, jnp.int32(t), idx)
        best = jnp.maximum(best, cur)

    out_ref[...] = idx.astype(jnp.float32)             # single (SEQ, BATCH) store


# ------------------------------ wrapper (glue) --------------------------------
def _compose_post_bn_operator(params):
    """Compose conv1∘pool1∘conv2∘pool2∘conv3∘linear into (A, bias).

    chain(x_flat) = x_flat @ A + bias, with x_flat the (BATCH*NUM_INPUTS,) flattened
    per-seq-position input and the output flattened token-major (t*BATCH + channel).
    """
    W1, b1 = params["W1"], params["b1"]
    W2, b2 = params["W2"], params["b2"]
    W3, b3 = params["W3"], params["b3"]
    Wl, bl = params["Wlin"], params["blin"]

    def chain(x_flat):
        x = x_flat.reshape(BATCH, NUM_INPUTS)                              # (C_in, L)
        taps = jnp.stack([x[:, k:k + L1] for k in range(K1)], 0)           # (K1, C, L1)
        h = jnp.einsum("oik,kil->ol", W1, taps) + b1[:, None]              # (CO1, L1)
        h = h[:, :L2 * P1K].reshape(CO1, L2, P1K).mean(-1)                 # (CO1, L2)
        h = jnp.einsum("oi,il->ol", W2[:, :, 0], h) + b2[:, None]          # (CO2, L2)
        h = h[:, :L3 * P2K].reshape(CO2, L3, P2K).mean(-1)                 # (CO2, L3)
        taps = jnp.stack([h[:, k:k + L4] for k in range(K3)], 0)           # (K3, CO2, L4)
        g = jnp.einsum("oik,kil->ol", W3, taps) + b3[:, None]              # (CO3, L4)
        logits = g @ Wl.T + bl[None, :]                                    # (CO3, NT)
        return logits.T.reshape(-1)                                        # token-major

    bias = chain(jnp.zeros((FLAT_IN,), jnp.float32))                       # (96,)
    A = jax.vmap(chain)(jnp.eye(FLAT_IN, dtype=jnp.float32)) - bias        # (640, 96)
    return A.astype(jnp.float32), bias.reshape(1, FLAT_OUT).astype(jnp.float32)


@jax.jit
def generator_forward_pallas(tokens, params):
    # Embedding + scale + positional-embedding concat (gather glue in plain JAX).
    emb = params["emb"][tokens] * math.sqrt(NUM_INPUTS)        # (SEQ, BATCH, NUM_INPUTS-3)
    x = jnp.concatenate([emb, params["pos"]], axis=2)          # (SEQ, BATCH, NUM_INPUTS)
    x_flat = x.reshape(SEQ, FLAT_IN).astype(jnp.float32)       # (SEQ, 640)

    # Composed affine operator for the whole post-BN chain (fused by XLA under jit).
    A, bias = _compose_post_bn_operator(params)

    out = pl.pallas_call(
        generator_kernel,
        out_shape=jax.ShapeDtypeStruct((SEQ, BATCH), jnp.float32),
        in_specs=[pl.BlockSpec(memory_space=pltpu.MemorySpace.VMEM)] * 3,
        out_specs=pl.BlockSpec(memory_space=pltpu.MemorySpace.VMEM),
    )(x_flat, A, bias)
    return out                                                 # (SEQ, BATCH) float32


# -------------------------- pure-JAX reference check --------------------------
def generator_forward_reference(tokens, params):
    emb = params["emb"][tokens] * math.sqrt(NUM_INPUTS)
    x = jnp.concatenate([emb, params["pos"]], axis=2)          # (SEQ, BATCH, NUM_INPUTS)
    for _ in range(NUM_LAYERS):
        xs = jnp.swapaxes(x, 0, 1)                             # (BATCH, SEQ, NUM_INPUTS)
        m = xs.mean(axis=(0, 2), keepdims=True)
        v = ((xs - m) ** 2).mean(axis=(0, 2), keepdims=True)
        xs = (xs - m) / jnp.sqrt(v + BN_EPS)
        x = jnp.swapaxes(xs, 0, 1)

    dn = ("NCH", "OIH", "NCH")

    def avgpool(z, k):
        lo = z.shape[2] // k
        return z[:, :, : lo * k].reshape(z.shape[0], z.shape[1], lo, k).mean(-1)

    out = jax.lax.conv_general_dilated(x, params["W1"], (1,), "VALID",
                                       dimension_numbers=dn) + params["b1"][None, :, None]
    out = avgpool(out, P1K)
    out = jax.lax.conv_general_dilated(out, params["W2"], (1,), "VALID",
                                       dimension_numbers=dn) + params["b2"][None, :, None]
    out = avgpool(out, P2K)
    out = jax.lax.conv_general_dilated(out, params["W3"], (1,), "VALID",
                                       dimension_numbers=dn) + params["b3"][None, :, None]
    logits = out @ params["Wlin"].T + params["blin"]           # (SEQ, BATCH, NT)
    return jnp.argmax(logits, axis=-1).astype(jnp.float32), logits


# ----------------------------------- main -------------------------------------
if __name__ == "__main__":
    key = jax.random.PRNGKey(0)
    ks = jax.random.split(key, 12)

    params = {
        "emb": jax.random.normal(ks[0], (NUM_TOKENS, NUM_INPUTS - 3), jnp.float32),
        "pos": jnp.tile(jax.random.normal(ks[1], (SEQ, 1, 3), jnp.float32),
                        (1, BATCH, 1)),
        "W1": 0.1 * jax.random.normal(ks[2], (CO1, BATCH, K1), jnp.float32),
        "b1": 0.1 * jax.random.normal(ks[3], (CO1,), jnp.float32),
        "W2": 0.1 * jax.random.normal(ks[4], (CO2, CO1, 1), jnp.float32),
        "b2": 0.1 * jax.random.normal(ks[5], (CO2,), jnp.float32),
        "W3": 0.1 * jax.random.normal(ks[6], (CO3, CO2, K3), jnp.float32),
        "b3": 0.1 * jax.random.normal(ks[7], (CO3,), jnp.float32),
        "Wlin": 0.1 * jax.random.normal(ks[8], (NUM_TOKENS, L4), jnp.float32),
        "blin": 0.1 * jax.random.normal(ks[9], (NUM_TOKENS,), jnp.float32),
    }
    # TODO(synk): BatchNorm running-stat updates (training-time side effect) are
    # not reproduced; forward output uses batch statistics exactly as PyTorch does.

    tokens = jax.random.randint(ks[10], (SEQ, BATCH), 0, NUM_TOKENS, dtype=jnp.int32)

    notes = jax.block_until_ready(generator_forward_pallas(tokens, params))
    ref_idx, ref_logits = generator_forward_reference(tokens, params)
    ref_idx = jax.block_until_ready(ref_idx)

    assert notes.shape == (SEQ, BATCH) and notes.dtype == jnp.float32

    # Exact-index match, with a tolerance fallback for near-tied logits (the
    # composed-operator / fused-BN accumulation order differs from the reference).
    exact = notes == ref_idx
    chosen = jnp.take_along_axis(ref_logits, notes.astype(jnp.int32)[..., None],
                                 axis=-1)[..., 0]
    near_tie = chosen >= ref_logits.max(-1) - 1e-3
    if not bool(jnp.all(exact | near_tie)):
        raise AssertionError("Pallas kernel output mismatch vs JAX reference")

    print("KERNEL_OK")
</pallas_src>

<mosaic_0001>
module attributes {stable_mosaic.version = 11 : i64} {
  func.func @generator_kernel(%arg0: memref<16x640xf32, #tpu.memory_space<vmem>>, %arg1: memref<640x96xf32, #tpu.memory_space<vmem>>, %arg2: memref<1x96xf32, #tpu.memory_space<vmem>>, %arg3: memref<16x8xf32, #tpu.memory_space<vmem>>) attributes {dimension_semantics = [], scalar_prefetch = 0 : i64, scratch_operands = 0 : i64, tpu.core_type = #tpu.core_type<tc>} {
    %c0 = arith.constant 0 : index
    %c0_0 = arith.constant 0 : index
    %0 = vector.load %arg0[%c0, %c0_0] : memref<16x640xf32, #tpu.memory_space<vmem>>, vector<16x640xf32>
    %cst = arith.constant dense<0.000000e+00> : vector<16xf32>
    %1 = vector.multi_reduction <add>, %0, %cst [1] : vector<16x640xf32> to vector<16xf32>
    %2 = vector.shape_cast %1 : vector<16xf32> to vector<16x1xf32>
    %cst_1 = arith.constant 6.400000e+02 : f32
    %3 = vector.broadcast %cst_1 : f32 to vector<16x1xf32>
    %4 = arith.divf %2, %3 : vector<16x1xf32>
    %5 = vector.broadcast %4 : vector<16x1xf32> to vector<16x640xf32>
    %6 = arith.subf %0, %5 : vector<16x640xf32>
    %7 = arith.mulf %6, %6 : vector<16x640xf32>
    %cst_2 = arith.constant dense<0.000000e+00> : vector<16xf32>
    %8 = vector.multi_reduction <add>, %7, %cst_2 [1] : vector<16x640xf32> to vector<16xf32>
    %9 = vector.shape_cast %8 : vector<16xf32> to vector<16x1xf32>
    %cst_3 = arith.constant 6.400000e+02 : f32
    %10 = vector.broadcast %cst_3 : f32 to vector<16x1xf32>
    %11 = arith.divf %9, %10 : vector<16x1xf32>
    %cst_4 = arith.constant 9.99999974E-6 : f32
    %12 = vector.broadcast %cst_4 : f32 to vector<16x1xf32>
    %13 = arith.addf %11, %12 : vector<16x1xf32>
    %14 = math.rsqrt %13 : vector<16x1xf32>
    %15 = arith.mulf %14, %14 : vector<16x1xf32>
    %16 = arith.mulf %11, %15 : vector<16x1xf32>
    %cst_5 = arith.constant 9.99999974E-6 : f32
    %17 = vector.broadcast %cst_5 : f32 to vector<16x1xf32>
    %18 = arith.addf %16, %17 : vector<16x1xf32>
    %19 = math.rsqrt %18 : vector<16x1xf32>
    %20 = arith.mulf %14, %19 : vector<16x1xf32>
    %21 = vector.broadcast %20 : vector<16x1xf32> to vector<16x640xf32>
    %22 = arith.mulf %6, %21 : vector<16x640xf32>
    %c0_6 = arith.constant 0 : index
    %c0_7 = arith.constant 0 : index
    %23 = vector.load %arg1[%c0_6, %c0_7] : memref<640x96xf32, #tpu.memory_space<vmem>>, vector<640x96xf32>
    %cst_8 = arith.constant dense<0.000000e+00> : vector<16x96xf32>
    %24 = tpu.matmul %22, %23, %cst_8 {dimension_numbers = #tpu.dot_dimension_numbers<[1], [0], [0], [1], [0, 0, 1, 1], [], []>} : vector<16x640xf32>, vector<640x96xf32>, vector<16x96xf32> -> vector<16x96xf32>
    %c0_9 = arith.constant 0 : index
    %c0_10 = arith.constant 0 : index
    %25 = vector.load %arg2[%c0_9, %c0_10] : memref<1x96xf32, #tpu.memory_space<vmem>>, vector<1x96xf32>
    %26 = vector.broadcast %25 : vector<1x96xf32> to vector<16x96xf32>
    %27 = arith.addf %24, %26 : vector<16x96xf32>
    %28 = vector.extract_strided_slice %27 {offsets = [0, 0], sizes = [16, 8], strides = [1, 1]} : vector<16x96xf32> to vector<16x8xf32>
    %c0_i32 = arith.constant 0 : i32
    %29 = vector.broadcast %c0_i32 : i32 to vector<16x8xi32>
    %30 = vector.extract_strided_slice %27 {offsets = [0, 8], sizes = [16, 8], strides = [1, 1]} : vector<16x96xf32> to vector<16x8xf32>
    %31 = arith.cmpf ogt, %30, %28 : vector<16x8xf32>
    %c1_i32 = arith.constant 1 : i32
    %32 = vector.broadcast %c1_i32 : i32 to vector<16x8xi32>
    %33 = arith.select %31, %32, %29 : vector<16x8xi1>, vector<16x8xi32>
    %34 = arith.maximumf %28, %30 : vector<16x8xf32>
    %35 = vector.extract_strided_slice %27 {offsets = [0, 16], sizes = [16, 8], strides = [1, 1]} : vector<16x96xf32> to vector<16x8xf32>
    %36 = arith.cmpf ogt, %35, %34 : vector<16x8xf32>
    %c2_i32 = arith.constant 2 : i32
    %37 = vector.broadcast %c2_i32 : i32 to vector<16x8xi32>
    %38 = arith.select %36, %37, %33 : vector<16x8xi1>, vector<16x8xi32>
    %39 = arith.maximumf %34, %35 : vector<16x8xf32>
    %40 = vector.extract_strided_slice %27 {offsets = [0, 24], sizes = [16, 8], strides = [1, 1]} : vector<16x96xf32> to vector<16x8xf32>
    %41 = arith.cmpf ogt, %40, %39 : vector<16x8xf32>
    %c3_i32 = arith.constant 3 : i32
    %42 = vector.broadcast %c3_i32 : i32 to vector<16x8xi32>
    %43 = arith.select %41, %42, %38 : vector<16x8xi1>, vector<16x8xi32>
    %44 = arith.maximumf %39, %40 : vector<16x8xf32>
    %45 = vector.extract_strided_slice %27 {offsets = [0, 32], sizes = [16, 8], strides = [1, 1]} : vector<16x96xf32> to vector<16x8xf32>
    %46 = arith.cmpf ogt, %45, %44 : vector<16x8xf32>
    %c4_i32 = arith.constant 4 : i32
    %47 = vector.broadcast %c4_i32 : i32 to vector<16x8xi32>
    %48 = arith.select %46, %47, %43 : vector<16x8xi1>, vector<16x8xi32>
    %49 = arith.maximumf %44, %45 : vector<16x8xf32>
    %50 = vector.extract_strided_slice %27 {offsets = [0, 40], sizes = [16, 8], strides = [1, 1]} : vector<16x96xf32> to vector<16x8xf32>
    %51 = arith.cmpf ogt, %50, %49 : vector<16x8xf32>
    %c5_i32 = arith.constant 5 : i32
    %52 = vector.broadcast %c5_i32 : i32 to vector<16x8xi32>
    %53 = arith.select %51, %52, %48 : vector<16x8xi1>, vector<16x8xi32>
    %54 = arith.maximumf %49, %50 : vector<16x8xf32>
    %55 = vector.extract_strided_slice %27 {offsets = [0, 48], sizes = [16, 8], strides = [1, 1]} : vector<16x96xf32> to vector<16x8xf32>
    %56 = arith.cmpf ogt, %55, %54 : vector<16x8xf32>
    %c6_i32 = arith.constant 6 : i32
    %57 = vector.broadcast %c6_i32 : i32 to vector<16x8xi32>
    %58 = arith.select %56, %57, %53 : vector<16x8xi1>, vector<16x8xi32>
    %59 = arith.maximumf %54, %55 : vector<16x8xf32>
    %60 = vector.extract_strided_slice %27 {offsets = [0, 56], sizes = [16, 8], strides = [1, 1]} : vector<16x96xf32> to vector<16x8xf32>
    %61 = arith.cmpf ogt, %60, %59 : vector<16x8xf32>
    %c7_i32 = arith.constant 7 : i32
    %62 = vector.broadcast %c7_i32 : i32 to vector<16x8xi32>
    %63 = arith.select %61, %62, %58 : vector<16x8xi1>, vector<16x8xi32>
    %64 = arith.maximumf %59, %60 : vector<16x8xf32>
    %65 = vector.extract_strided_slice %27 {offsets = [0, 64], sizes = [16, 8], strides = [1, 1]} : vector<16x96xf32> to vector<16x8xf32>
    %66 = arith.cmpf ogt, %65, %64 : vector<16x8xf32>
    %c8_i32 = arith.constant 8 : i32
    %67 = vector.broadcast %c8_i32 : i32 to vector<16x8xi32>
    %68 = arith.select %66, %67, %63 : vector<16x8xi1>, vector<16x8xi32>
    %69 = arith.maximumf %64, %65 : vector<16x8xf32>
    %70 = vector.extract_strided_slice %27 {offsets = [0, 72], sizes = [16, 8], strides = [1, 1]} : vector<16x96xf32> to vector<16x8xf32>
    %71 = arith.cmpf ogt, %70, %69 : vector<16x8xf32>
    %c9_i32 = arith.constant 9 : i32
    %72 = vector.broadcast %c9_i32 : i32 to vector<16x8xi32>
    %73 = arith.select %71, %72, %68 : vector<16x8xi1>, vector<16x8xi32>
    %74 = arith.maximumf %69, %70 : vector<16x8xf32>
    %75 = vector.extract_strided_slice %27 {offsets = [0, 80], sizes = [16, 8], strides = [1, 1]} : vector<16x96xf32> to vector<16x8xf32>
    %76 = arith.cmpf ogt, %75, %74 : vector<16x8xf32>
    %c10_i32 = arith.constant 10 : i32
    %77 = vector.broadcast %c10_i32 : i32 to vector<16x8xi32>
    %78 = arith.select %76, %77, %73 : vector<16x8xi1>, vector<16x8xi32>
    %79 = arith.maximumf %74, %75 : vector<16x8xf32>
    %80 = vector.extract_strided_slice %27 {offsets = [0, 88], sizes = [16, 8], strides = [1, 1]} : vector<16x96xf32> to vector<16x8xf32>
    %81 = arith.cmpf ogt, %80, %79 : vector<16x8xf32>
    %c11_i32 = arith.constant 11 : i32
    %82 = vector.broadcast %c11_i32 : i32 to vector<16x8xi32>
    %83 = arith.select %81, %82, %78 : vector<16x8xi1>, vector<16x8xi32>
    %84 = arith.sitofp %83 : vector<16x8xi32> to vector<16x8xf32>
    %c0_11 = arith.constant 0 : index
    %c0_12 = arith.constant 0 : index
    %85 = vector.load %arg3[%c0_11, %c0_12] : memref<16x8xf32, #tpu.memory_space<vmem>>, vector<16x8xf32>
    tpu.vector_store %arg3[%c0_11, %c0_12], %84 {strides = array<i32>} : memref<16x8xf32, #tpu.memory_space<vmem>>, vector<16x8xf32>,
    return
  }
}

</mosaic_0001>

<bundles_post_ra>
// kernel: sub.5
= control target key start
LH: loop header
LB: loop body
LE: loop exit
PB: predicated region body
PF: predicated region fallthrough
CT: control target
= control target key end

     0   :  { %s101_s10 = smov 88   ;;  %s102_s11 = smov 72   ;;  %vm3_vm0 = vcmask 64512   ;;  %vm9_vm1 = vcmask 786112   ;;  %vm15_vm2 = vcmask 720512   ;;  %vm21_vm3 = vcmask 654912   ;;  %s161_s0 = inlined_call_operand.vmem [shape: f32[12,8], index: 0, kind: input, shape index: {}]   ;;  %s162_s1 = inlined_call_operand.vmem [shape: f32[96], index: 1, kind: output, shape index: {}]  }
   0x1   :  { %v79_v0 = vld [vmem:[%s161_s0 + $0xb] sm:$0x1]   ;;  %v81_v1 = vld [vmem:[%s161_s0 + $0x9] sm:$0x1]   ;;  %v80_v2 = vld [vmem:[%s161_s0 + $0xa] sm:$0x1]  }
   0x2   :  { %7 = vrot.lane.b32.xlu0 %v79_v0, %s101_s10  ;;  %19 = vrot.lane.b32.xlu1 %v81_v1, %s102_s11  ;;  %v82_v3 = vld [vmem:[%s161_s0 + $0x8] sm:$0x1]   ;;  %s103_s16 = smov 80   ;;  %s104_s17 = smov 64   ;;  %v83_v4 = vld [vmem:[%s161_s0 + $0x7] sm:$0x1]  }
   0x3   :  { %v2_v5 = vld [vmem:[%s161_s0] sm:$0x1]   ;;  %v84_v6 = vld [vmem:[%s161_s0 + $0x6] sm:$0x1]   ;;  %s105_s24 = smov 56   ;;  %s106_s25 = smov 48  }
   0x4   :  { %4 = vst.msk [vmem:[#allocation0] sm:$0x1] %vm3_vm0, %v2_v5   ;;  %v85_v7 = vld [vmem:[%s161_s0 + $0x5] sm:$0x1]   ;;  %v86_v8 = vld [vmem:[%s161_s0 + $0x4] sm:$0x1]  }
   0x5   :  { %s107_s30 = smov 40   ;;  %s108_s2 = smov 32   ;;  %v87_v9 = vld [vmem:[%s161_s0 + $0x3] sm:$0x1]   ;;  %v88_v10 = vld [vmem:[%s161_s0 + $0x2] sm:$0x1]  }
   0x6   :  { %13 = vrot.lane.b32.xlu0 %v80_v2, %s103_s16  ;;  %25 = vrot.lane.b32.xlu1 %v82_v3, %s104_s17  ;;  %s109_s7 = smov 24   ;;  %s110_s8 = smov 16   ;;  %v89_v11 = vld [vmem:[%s161_s0 + $0x1] sm:$0x1]   ;;  %vm27_vm4 = vcmask 589312   ;;  %vm33_vm5 = vcmask 523712  }
   0x7   :  { %s111_s0 = smov 8   ;;  %vm39_vm6 = vcmask 458112   ;;  %vm45_vm7 = vcmask 392512   ;;  %vm51_vm8 = vcmask 326912   ;;  %vm57_vm9 = vcmask 261312  }
   0x8   :  { %vm63_vm10 = vcmask 195712   ;;  %vm69_vm11 = vcmask 130112  }
   0xa   :  { %31 = vrot.lane.b32.xlu0 %v83_v4, %s105_s24  ;;  %37 = vrot.lane.b32.xlu1 %v84_v6, %s106_s25 }
   0xe   :  { %43 = vrot.lane.b32.xlu0 %v85_v7, %s107_s30  ;;  %49 = vrot.lane.b32.xlu1 %v86_v8, %s108_s2 }
  0x12   :  { %55 = vrot.lane.b32.xlu0 %v87_v9, %s109_s7  ;;  %61 = vrot.lane.b32.xlu1 %v88_v10, %s110_s8 }
  0x16   :  { %67 = vrot.lane.b32.xlu0 %v89_v11, %s111_s0 }
  0x74   :  { %v8_v12 = vpop.permute.xlu0 %7   ;;  %v20_v13 = vpop.permute.xlu1 %19  }
  0x75   :  { %10 = vst.msk [vmem:[#allocation0] sm:$0x1] %vm9_vm1, %v8_v12  }
  0x78   :  { %v14_v14 = vpop.permute.xlu0 %13   ;;  %v26_v15 = vpop.permute.xlu1 %25  }
  0x79   :  { %16 = vst.msk [vmem:[#allocation0] sm:$0x1] %vm15_vm2, %v14_v14  }
  0x7a   :  { %22 = vst.msk [vmem:[#allocation0] sm:$0x1] %vm21_vm3, %v20_v13  }
  0x7b   :  { %28 = vst.msk [vmem:[#allocation0] sm:$0x1] %vm27_vm4, %v26_v15  }
  0x7c   :  { %v32_v16 = vpop.permute.xlu0 %31   ;;  %v38_v17 = vpop.permute.xlu1 %37  }
  0x7d   :  { %34 = vst.msk [vmem:[#allocation0] sm:$0x1] %vm33_vm5, %v32_v16  }
  0x7e   :  { %40 = vst.msk [vmem:[#allocation0] sm:$0x1] %vm39_vm6, %v38_v17  }
  0x80   :  { %v44_v18 = vpop.permute.xlu0 %43   ;;  %v50_v19 = vpop.permute.xlu1 %49  }
  0x81   :  { %46 = vst.msk [vmem:[#allocation0] sm:$0x1] %vm45_vm7, %v44_v18  }
  0x82   :  { %52 = vst.msk [vmem:[#allocation0] sm:$0x1] %vm51_vm8, %v50_v19  }
  0x84   :  { %v56_v20 = vpop.permute.xlu0 %55   ;;  %v62_v21 = vpop.permute.xlu1 %61  }
  0x85   :  { %58 = vst.msk [vmem:[#allocation0] sm:$0x1] %vm57_vm9, %v56_v20  }
  0x86   :  { %64 = vst.msk [vmem:[#allocation0] sm:$0x1] %vm63_vm10, %v62_v21  }
  0x88   :  { %v68_v22 = vpop.permute.xlu0 %67  }
  0x89   :  { %70 = vst.msk [vmem:[#allocation0] sm:$0x1] %vm69_vm11, %v68_v22  }
  0x90   :  { %v75_v23 = vld [vmem:[#allocation0] sm:$0x1] }
  0x91   :  { %78 = vst [vmem:[%s162_s1] sm:$0x1] %v75_v23 }

// kernel: generator_forward_pallas.1
= control target key start
LH: loop header
LB: loop body
LE: loop exit
PB: predicated region body
PF: predicated region fallthrough
CT: control target
= control target key end

     0   :  { %s833_s26 = smov 8   ;;  %s835_s27 = smov 16   ;;  %s1293_s0 = inlined_call_operand.vmem [shape: f32[16,640], index: 0, kind: input, shape index: {}]   ;;  %s1294_s1 = inlined_call_operand.vmem [shape: f32[640,96], index: 1, kind: input, shape index: {}]   ;;  %s1295_s2 = inlined_call_operand.vmem [shape: f32[1,96], index: 2, kind: input, shape index: {}]   ;;  %s1296_s3 = inlined_call_operand.vmem [shape: f32[16,8], index: 3, kind: output, shape index: {}]  }
   0x1   :  { %v14_v0 = vld [vmem:[%s1293_s0] sm:$0xff]  ;;  %v15_v1 = vld [vmem:[%s1293_s0 + $0x8] sm:$0xff]  ;;  %v16_v2 = vld [vmem:[%s1293_s0 + $0x10] sm:$0xff]  ;;  %s837_s28 = smov 104   ;;  %s838_s29 = smov 24  }
   0x2   :  { %v24_v3 = vadd.f32 %v15_v1, %v14_v0  ;;  %v19_v4 = vld [vmem:[%s1293_s0 + $0x28] sm:$0xff]  ;;  %v17_v5 = vld [vmem:[%s1293_s0 + $0x18] sm:$0xff]  ;;  %v20_v6 = vld [vmem:[%s1293_s0 + $0x30] sm:$0xff]  ;;  %s839_s30 = smov 96   ;;  %s840_s4 = smov 32  }
   0x3   :  { %v21_v7 = vld [vmem:[%s1293_s0 + $0x38] sm:$0xff]  ;;  %v30_v9 = vadd.f32 %v20_v6, %v19_v4  ;;  %v18_v10 = vld [vmem:[%s1293_s0 + $0x20] sm:$0xff]  ;;  %v23_v14 = vld [vmem:[%s1293_s0 + $0x48] sm:$0xff]  ;;  %s842_s5 = smov 40   ;;  %s843_s6 = smov 80  }
   0x4   :  { %v25_v8 = vadd.f32 %v24_v3, %v16_v2  ;;  %v22_v11 = vld [vmem:[%s1293_s0 + $0x40] sm:$0xff]  ;;  %v128_v50 = vld [vmem:[%s1294_s1 + $0xf8] sm:$0xff]  ;;  %v127_v53 = vld [vmem:[%s1294_s1 + $0xf0] sm:$0xff]  ;;  %s841_s0 = smov 88   ;;  %s844_s7 = smov 48  }
   0x5   :  { %v31_v13 = vadd.f32 %v30_v9, %v21_v7  ;;  %679 = vmatprep.subr.mxu0 %v128_v50  ;;  %v112_v51 = vld [vmem:[%s1294_s1 + $0x78] sm:$0xff]  ;;  %v111_v55 = vld [vmem:[%s1294_s1 + $0x70] sm:$0xff]  ;;  %v126_v57 = vld [vmem:[%s1294_s1 + $0xe8] sm:$0xff]  ;;  %s845_s8 = smov 72   ;;  %s846_s9 = smov 56  }
   0x6   :  { %v26_v12 = vadd.f32 %v25_v8, %v17_v5  ;;  %v160_v52 = vld [vmem:[%s1294_s1 + $0x1f8] sm:$0xff]  ;;  %680 = vmatpush3.msra.mxu0 %v112_v51  ;;  %v159_v56 = vld [vmem:[%s1294_s1 + $0x1f0] sm:$0xff]  ;;  %v110_v59 = vld [vmem:[%s1294_s1 + $0x68] sm:$0xff]  ;;  %s847_s10 = smov 64  }
   0x7   :  { %v32_v16 = vadd.f32 %v31_v13, %v22_v11  ;;  %717 = vmatprep.subr.mxu1 %v160_v52  ;;  %v144_v54 = vld [vmem:[%s1294_s1 + $0x178] sm:$0xff]  ;;  %681 = vmatprep.subr.mxu0 %v127_v53  ;;  %v143_v58 = vld [vmem:[%s1294_s1 + $0x170] sm:$0xff]  ;;  %v158_v60 = vld [vmem:[%s1294_s1 + $0x1e8] sm:$0xff] }
   0x8   :  { %v27_v15 = vadd.f32 %v26_v12, %v18_v10  ;;  %718 = vmatpush3.msra.mxu1 %v144_v54  ;;  %682 = vmatpush3.msra.mxu0 %v111_v55  ;;  %v125_v61 = vld [vmem:[%s1294_s1 + $0xe0] sm:$0xff]  ;;  %v142_v62 = vld [vmem:[%s1294_s1 + $0x168] sm:$0xff]  ;;  %v108_v3 = vld [vmem:[%s1294_s1 + $0x58] sm:$0xff] }
   0x9   :  { %v33_v17 = vadd.f32 %v32_v16, %v23_v14  ;;  %719 = vmatprep.subr.mxu1 %v159_v56  ;;  %683 = vmatprep.subr.mxu0 %v126_v57  ;;  %v109_v63 = vld [vmem:[%s1294_s1 + $0x60] sm:$0xff]  ;;  %v155_v8 = vld [vmem:[%s1294_s1 + $0x1d0] sm:$0xff]  ;;  %v122_v9 = vld [vmem:[%s1294_s1 + $0xc8] sm:$0xff] }
   0xa   :  { %28 = vadd.xlane.f32.xlu0 %v27_v15  ;;  %720 = vmatpush3.msra.mxu1 %v143_v58  ;;  %v154_v12 = vld [vmem:[%s1294_s1 + $0x1c8] sm:$0xff]  ;;  %v121_v13 = vld [vmem:[%s1294_s1 + $0xc0] sm:$0xff]  ;;  %v147_v50 = vld [vmem:[%s1294_s1 + $0x190] sm:$0xff] }
   0xb   :  { %684 = vmatpush3.msra.mxu0 %v110_v59  ;;  %721 = vmatprep.subr.mxu1 %v158_v60  ;;  %v105_v15 = vld [vmem:[%s1294_s1 + $0x40] sm:$0xff]  ;;  %v114_v51 = vld [vmem:[%s1294_s1 + $0x88] sm:$0xff]  ;;  %v131_v52 = vld [vmem:[%s1294_s1 + $0x110] sm:$0xff] }
   0xc   :  { %685 = vmatprep.subr.mxu0 %v125_v61  ;;  %722 = vmatpush3.msra.mxu1 %v142_v62  ;;  %v153_v16 = vld [vmem:[%s1294_s1 + $0x1c0] sm:$0xff]  ;;  %v98_v53 = vld [vmem:[%s1294_s1 + $0x8] sm:$0xff]  ;;  %v176_v60 = vld [vmem:[%s1294_s1 + $0x278] sm:$0xff] }
   0xd   :  { %686 = vmatpush3.msra.mxu0 %v109_v63  ;;  %v146_v54 = vld [vmem:[%s1294_s1 + $0x188] sm:$0xff]  ;;  %v113_v55 = vld [vmem:[%s1294_s1 + $0x80] sm:$0xff] }
   0xe   :  { %34 = vadd.xlane.f32.xlu0 %v33_v17  ;;  %v120_v17 = vld [vmem:[%s1294_s1 + $0xb8] sm:$0xff]  ;;  %v130_v56 = vld [vmem:[%s1294_s1 + $0x108] sm:$0xff]  ;;  %v97_v57 = vld [vmem:[%s1294_s1] sm:$0xff] }
   0xf   :  { %v145_v58 = vld [vmem:[%s1294_s1 + $0x180] sm:$0xff] }
  0x10   :  { %v129_v59 = vld [vmem:[%s1294_s1 + $0x100] sm:$0xff] }
  0x93   :  { %v29_v18 = vpop.xlane.xlu0 %28 }
  0x94   :  { %v37_v19 = vmul.f32 0.0015625, %v29_v18  ;;  %v137_v18 = vld [vmem:[%s1294_s1 + $0x140] sm:$0xff] }
  0x96   :  { %v898_v20 = vsub.f32 %v14_v0, %v37_v19  ;;  %v900_v21 = vsub.f32 %v15_v1, %v37_v19  ;;  %v902_v22 = vsub.f32 %v16_v2, %v37_v19  ;;  %v904_v24 = vsub.f32 %v17_v5, %v37_v19  ;;  %v157_v0 = vld [vmem:[%s1294_s1 + $0x1e0] sm:$0xff]  ;;  %v124_v1 = vld [vmem:[%s1294_s1 + $0xd8] sm:$0xff]  ;;  %v123_v5 = vld [vmem:[%s1294_s1 + $0xd0] sm:$0xff] }
  0x97   :  { %v35_v23 = vpop.xlane.xlu0 %34  ;;  %v910_v28 = vsub.f32 %v18_v10, %v37_v19  ;;  %723 = vmatprep.subr.mxu1 %v157_v0  ;;  %v141_v2 = vld [vmem:[%s1294_s1 + $0x160] sm:$0xff]  ;;  %687 = vmatprep.subr.mxu0 %v124_v1  ;;  %v139_v10 = vld [vmem:[%s1294_s1 + $0x150] sm:$0xff]  ;;  %v104_v19 = vld [vmem:[%s1294_s1 + $0x38] sm:$0xff] }
  0x98   :  { %v38_v25 = vmul.f32 0.0015625, %v35_v23  ;;  %v49_v26 = vmul.f32 %v898_v20, %v898_v20  ;;  %v50_v27 = vmul.f32 %v900_v21, %v900_v21  ;;  %v51_v29 = vmul.f32 %v902_v22, %v902_v22  ;;  %724 = vmatpush3.msra.mxu1 %v141_v2  ;;  %688 = vmatpush3.msra.mxu0 %v108_v3  ;;  %v152_v23 = vld [vmem:[%s1294_s1 + $0x1b8] sm:$0xff] }
  0x99   :  { %v52_v34 = vmul.f32 %v904_v24, %v904_v24  ;;  %v53_v41 = vmul.f32 %v910_v28, %v910_v28  ;;  %689 = vmatprep.subr.mxu0 %v123_v5 }
  0x9a   :  { %v59_v30 = vadd.f32 %v50_v27, %v49_v26  ;;  %v914_v31 = vsub.f32 %v19_v4, %v38_v25  ;;  %v916_v32 = vsub.f32 %v20_v6, %v38_v25  ;;  %v918_v33 = vsub.f32 %v21_v7, %v38_v25  ;;  %v156_v4 = vld [vmem:[%s1294_s1 + $0x1d8] sm:$0xff]  ;;  %v107_v7 = vld [vmem:[%s1294_s1 + $0x50] sm:$0xff] }
  0x9b   :  { %v922_v35 = vsub.f32 %v22_v11, %v38_v25  ;;  %v924_v36 = vsub.f32 %v23_v14, %v38_v25  ;;  %725 = vmatprep.subr.mxu1 %v156_v4  ;;  %v140_v6 = vld [vmem:[%s1294_s1 + $0x158] sm:$0xff]  ;;  %690 = vmatpush3.msra.mxu0 %v107_v7  ;;  %v106_v11 = vld [vmem:[%s1294_s1 + $0x48] sm:$0xff]  ;;  %v119_v25 = vld [vmem:[%s1294_s1 + $0xb0] sm:$0xff] }
  0x9c   :  { %v60_v37 = vadd.f32 %v59_v30, %v51_v29  ;;  %v54_v38 = vmul.f32 %v914_v31, %v914_v31  ;;  %v55_v39 = vmul.f32 %v916_v32, %v916_v32  ;;  %v56_v40 = vmul.f32 %v918_v33, %v918_v33  ;;  %726 = vmatpush3.msra.mxu1 %v140_v6  ;;  %v138_v14 = vld [vmem:[%s1294_s1 + $0x148] sm:$0xff]  ;;  %v136_v26 = vld [vmem:[%s1294_s1 + $0x138] sm:$0xff]  ;;  %v103_v27 = vld [vmem:[%s1294_s1 + $0x30] sm:$0xff] }
  0x9d   :  { %v57_v43 = vmul.f32 %v922_v35, %v922_v35  ;;  %v58_v46 = vmul.f32 %v924_v36, %v924_v36  ;;  %727 = vmatprep.subr.mxu1 %v155_v8  ;;  %691 = vmatprep.subr.mxu0 %v122_v9  ;;  %v151_v29 = vld [vmem:[%s1294_s1 + $0x1b0] sm:$0xff]  ;;  %v118_v30 = vld [vmem:[%s1294_s1 + $0xa8] sm:$0xff] }
  0x9e   :  { %v61_v42 = vadd.f32 %v60_v37, %v52_v34  ;;  %v65_v44 = vadd.f32 %v55_v39, %v54_v38  ;;  %728 = vmatpush3.msra.mxu1 %v139_v10  ;;  %692 = vmatpush3.msra.mxu0 %v106_v11  ;;  %v135_v34 = vld [vmem:[%s1294_s1 + $0x130] sm:$0xff]  ;;  %v102_v37 = vld [vmem:[%s1294_s1 + $0x28] sm:$0xff]  ;;  %v117_v39 = vld [vmem:[%s1294_s1 + $0xa0] sm:$0xff] }
  0x9f   :  { %729 = vmatprep.subr.mxu1 %v154_v12  ;;  %693 = vmatprep.subr.mxu0 %v121_v13  ;;  %v150_v38 = vld [vmem:[%s1294_s1 + $0x1a8] sm:$0xff] }
  0xa0   :  { %v62_v45 = vadd.f32 %v61_v42, %v53_v41  ;;  %v66_v47 = vadd.f32 %v65_v44, %v56_v40  ;;  %730 = vmatpush3.msra.mxu1 %v138_v14  ;;  %694 = vmatpush3.msra.mxu0 %v105_v15  ;;  %v134_v40 = vld [vmem:[%s1294_s1 + $0x128] sm:$0xff]  ;;  %v101_v41 = vld [vmem:[%s1294_s1 + $0x20] sm:$0xff] }
  0xa1   :  { %731 = vmatprep.subr.mxu1 %v153_v16  ;;  %695 = vmatprep.subr.mxu0 %v120_v17  ;;  %v149_v42 = vld [vmem:[%s1294_s1 + $0x1a0] sm:$0xff] }
  0xa2   :  { %63 = vadd.xlane.f32.xlu1 %v62_v45  ;;  %v67_v48 = vadd.f32 %v66_v47, %v57_v43  ;;  %732 = vmatpush3.msra.mxu1 %v137_v18  ;;  %v116_v43 = vld [vmem:[%s1294_s1 + $0x98] sm:$0xff]  ;;  %v133_v44 = vld [vmem:[%s1294_s1 + $0x120] sm:$0xff]  ;;  %v115_v47 = vld [vmem:[%s1294_s1 + $0x90] sm:$0xff] }
  0xa3   :  { %696 = vmatpush3.msra.mxu0 %v104_v19  ;;  %733 = vmatprep.subr.mxu1 %v152_v23  ;;  %v100_v45 = vld [vmem:[%s1294_s1 + $0x18] sm:$0xff]  ;;  %v175_v18 = vld [vmem:[%s1294_s1 + $0x270] sm:$0xff] }
  0xa4   :  { %v68_v49 = vadd.f32 %v67_v48, %v58_v46  ;;  %697 = vmatprep.subr.mxu0 %v119_v25  ;;  %734 = vmatpush3.msra.mxu1 %v136_v26  ;;  %v148_v46 = vld [vmem:[%s1294_s1 + $0x198] sm:$0xff]  ;;  %v173_v25 = vld [vmem:[%s1294_s1 + $0x260] sm:$0xff] }
  0xa5   :  { %698 = vmatpush3.msra.mxu0 %v103_v27  ;;  %735 = vmatprep.subr.mxu1 %v151_v29  ;;  %v132_v48 = vld [vmem:[%s1294_s1 + $0x118] sm:$0xff]  ;;  %v167_v27 = vld [vmem:[%s1294_s1 + $0x230] sm:$0xff]  ;;  %v166_v29 = vld [vmem:[%s1294_s1 + $0x228] sm:$0xff] }
  0xa6   :  { %69 = vadd.xlane.f32.xlu1 %v68_v49  ;;  %699 = vmatprep.subr.mxu0 %v118_v30  ;;  %v99_v49 = vld [vmem:[%s1294_s1 + $0x10] sm:$0xff]  ;;  %v168_v26 = vld [vmem:[%s1294_s1 + $0x238] sm:$0xff]  ;;  %v165_v30 = vld [vmem:[%s1294_s1 + $0x220] sm:$0xff] }
  0xa7   :  { %736 = vmatpush3.msra.mxu1 %v135_v34  ;;  %700 = vmatpush3.msra.mxu0 %v102_v37  ;;  %v164_v34 = vld [vmem:[%s1294_s1 + $0x218] sm:$0xff]  ;;  %v163_v37 = vld [vmem:[%s1294_s1 + $0x210] sm:$0xff] }
  0xa8   :  { %737 = vmatprep.subr.mxu1 %v150_v38  ;;  %701 = vmatprep.subr.mxu0 %v117_v39  ;;  %v162_v38 = vld [vmem:[%s1294_s1 + $0x208] sm:$0xff]  ;;  %v161_v39 = vld [vmem:[%s1294_s1 + $0x200] sm:$0xff] }
  0xa9   :  { %738 = vmatpush3.msra.mxu1 %v134_v40  ;;  %702 = vmatpush3.msra.mxu0 %v101_v41 }
  0xaa   :  { %739 = vmatprep.subr.mxu1 %v149_v42  ;;  %703 = vmatprep.subr.mxu0 %v116_v43 }
  0xab   :  { %740 = vmatpush3.msra.mxu1 %v133_v44  ;;  %704 = vmatpush3.msra.mxu0 %v100_v45 }
  0xac   :  { %741 = vmatprep.subr.mxu1 %v148_v46  ;;  %705 = vmatprep.subr.mxu0 %v115_v47 }
  0xad   :  { %742 = vmatpush3.msra.mxu1 %v132_v48  ;;  %706 = vmatpush3.msra.mxu0 %v99_v49 }
  0xae   :  { %743 = vmatprep.subr.mxu1 %v147_v50  ;;  %707 = vmatprep.subr.mxu0 %v114_v51  ;;  %v678_v50 = vld [vmem:[%s1295_s2] ss:$0 sm:$0xff]  ;;  %s834_s2 = smov 112  }
  0xaf   :  { %744 = vmatpush3.msra.mxu1 %v131_v52  ;;  %708 = vmatpush3.msra.mxu0 %v98_v53 }
  0xb0   :  { %745 = vmatprep.subr.mxu1 %v146_v54  ;;  %709 = vmatprep.subr.mxu0 %v113_v55 }
  0xb1   :  { %746 = vmatpush3.msra.mxu1 %v130_v56  ;;  %710 = vmatpush3.msra.mxu0 %v97_v57 }
  0xb2   :  { %747 = vmatprep.subr.mxu1 %v145_v58  ;;  %773 = vmatprep.subr.mxu0 %v176_v60 }
  0xb3   :  { %748 = vmatpush3.msra.mxu1 %v129_v59 }
 0x12b   :  { %v64_v61 = vpop.xlane.xlu1 %63 }
 0x12c   :  { %v71_v62 = vmul.f32 0.0015625, %v64_v61 }
 0x12e   :  { %v73_v63 = vadd.f32 1e-05, %v71_v62 }
 0x12f   :  { %v70_v0 = vpop.xlane.xlu1 %69 }
 0x130   :  { %824 = vrsqrt.f32 %v73_v63  ;;  %v72_v1 = vmul.f32 0.0015625, %v70_v0 }
 0x132   :  { %v74_v2 = vadd.f32 1e-05, %v72_v1 }
 0x134   :  { %826 = vrsqrt.f32 %v74_v2  ;;  %v836_v2 = vmov 0  }
 0x13d   :  { %v825_v3 = vpop.eup %824 }
 0x13e   :  { %v77_v4 = vmul.f32 %v825_v3, %v825_v3 }
 0x140   :  { %v79_v5 = vmul.f32 %v77_v4, %v71_v62 }
 0x141   :  { %v827_v6 = vpop.eup %826 }
 0x142   :  { %v81_v7 = vadd.f32 1e-05, %v79_v5  ;;  %v78_v8 = vmul.f32 %v827_v6, %v827_v6 }
 0x144   :  { %828 = vrsqrt.f32 %v81_v7  ;;  %v80_v9 = vmul.f32 %v78_v8, %v72_v1 }
 0x146   :  { %v82_v10 = vadd.f32 1e-05, %v80_v9 }
 0x148   :  { %830 = vrsqrt.f32 %v82_v10 }
 0x151   :  { %v829_v11 = vpop.eup %828 }
 0x152   :  { %v85_v12 = vmul.f32 %v829_v11, %v825_v3 }
 0x154   :  { %v88_v13 = vmul.f32 %v85_v12, %v900_v21  ;;  %v90_v14 = vmul.f32 %v85_v12, %v904_v24  ;;  %v87_v15 = vmul.f32 %v85_v12, %v898_v20  ;;  %v89_v16 = vmul.f32 %v85_v12, %v902_v22  ;;  %v174_v20 = vld [vmem:[%s1294_s1 + $0x268] sm:$0xff] }
 0x155   :  { %v831_v17 = vpop.eup %830 }
 0x156   :  { %248 = vmatprep.mubr.f32.mxu0 %v88_v13  ;;  %323 = vmatprep.mubr.f32.mxu1 %v90_v14  ;;  %v86_v19 = vmul.f32 %v831_v17, %v827_v6 }
 0x157   :  { %249 = vmatmul.mubr.f32.vlgmr.msra.gmra.mxu0 %v87_v15  ;;  %324 = vmatmul.mubr.f32.vlgmr.msra.gmra.mxu1 %v89_v16 }
 0x158   :  { %774 = vmatpush3.msra.mxu0 %v176_v60  ;;  %v93_v23 = vmul.f32 %v86_v19, %v916_v32  ;;  %v95_v21 = vmul.f32 %v86_v19, %v922_v35  ;;  %v92_v22 = vmul.f32 %v86_v19, %v914_v31  ;;  %v94_v24 = vmul.f32 %v86_v19, %v918_v33  ;;  %v172_v31 = vld [vmem:[%s1294_s1 + $0x258] sm:$0xff]  ;;  %v171_v33 = vld [vmem:[%s1294_s1 + $0x250] sm:$0xff]  ;;  %v169_v35 = vld [vmem:[%s1294_s1 + $0x240] sm:$0xff] }
 0x159   :  { %775 = vmatprep.subr.mxu0 %v175_v18  ;;  %v91_v32 = vmul.f32 %v85_v12, %v910_v28  ;;  %v170_v28 = vld [vmem:[%s1294_s1 + $0x248] sm:$0xff]  ;;  %v96_v40 = vmul.f32 %v86_v19, %v924_v36  ;;  %s832_s1 = smov 120  }
 0x15a   :  { %776 = vmatpush3.msra.mxu0 %v175_v18  ;;  %253 = vmatprep.mubr.f32.mxu0 %v93_v23 }
 0x15b   :  { %328 = vmatprep.mubr.f32.mxu1 %v95_v21  ;;  %777 = vmatprep.subr.mxu0 %v174_v20 }
 0x15c   :  { %254 = vmatmul.mubr.f32.gmra.mxu0 %v92_v22  ;;  %329 = vmatmul.mubr.f32.gmra.mxu1 %v94_v24 }
 0x15d   :  { %778 = vmatpush3.msra.mxu0 %v174_v20  ;;  %805 = vmatprep.mubr.f32.mxu0 %v91_v32 }
 0x15e   :  { %779 = vmatprep.subr.mxu0 %v173_v25 }
 0x15f   :  { %780 = vmatpush3.msra.mxu0 %v173_v25 }
 0x160   :  { %781 = vmatprep.subr.mxu0 %v172_v31 }
 0x161   :  { %782 = vmatpush3.msra.mxu0 %v172_v31 }
 0x162   :  { %783 = vmatprep.subr.mxu0 %v171_v33 }
 0x163   :  { %784 = vmatpush3.msra.mxu0 %v171_v33 }
 0x164   :  { %785 = vmatprep.subr.mxu0 %v170_v28 }
 0x165   :  { %786 = vmatpush3.msra.mxu0 %v170_v28 }
 0x166   :  { %787 = vmatprep.subr.mxu0 %v169_v35 }
 0x167   :  { %788 = vmatpush3.msra.mxu0 %v169_v35 }
 0x168   :  { %789 = vmatprep.subr.mxu0 %v168_v26 }
 0x169   :  { %790 = vmatpush3.msra.mxu0 %v168_v26 }
 0x16a   :  { %791 = vmatprep.subr.mxu0 %v167_v27 }
 0x16b   :  { %792 = vmatpush3.msra.mxu0 %v167_v27 }
 0x16c   :  { %793 = vmatprep.subr.mxu0 %v166_v29 }
 0x16d   :  { %794 = vmatpush3.msra.mxu0 %v166_v29 }
 0x16e   :  { %795 = vmatprep.subr.mxu0 %v165_v30 }
 0x16f   :  { %796 = vmatpush3.msra.mxu0 %v165_v30 }
 0x170   :  { %797 = vmatprep.subr.mxu0 %v164_v34 }
 0x171   :  { %798 = vmatpush3.msra.mxu0 %v164_v34 }
 0x172   :  { %799 = vmatprep.subr.mxu0 %v163_v37 }
 0x173   :  { %800 = vmatpush3.msra.mxu0 %v163_v37 }
 0x174   :  { %801 = vmatprep.subr.mxu0 %v162_v38 }
 0x175   :  { %802 = vmatpush3.msra.mxu0 %v162_v38 }
 0x176   :  { %803 = vmatprep.subr.mxu0 %v161_v39 }
 0x177   :  { %804 = vmatpush3.msra.mxu0 %v161_v39 }
 0x178   :  { %806 = vmatmul.mubr.f32.vlgmr.msra.gmra.mxu0 %v96_v40 }
 0x217   :  { %v711_v41 = vpop.f32.mrf.mxu0  ;;  %v749_v43 = vpop.f32.mrf.mxu1 }
 0x219   :  { %v712_v42 = vpop.f32.mrf.mxu0  ;;  %v750_v45 = vpop.f32.mrf.mxu1 }
 0x21a   :  { %v713_v49 = vadd.f32 %v712_v42, %v711_v41  ;;  %v751_v36 = vadd.f32 %v750_v45, %v749_v43 }
 0x21c   :  { %v714_v44 = vpop.f32.mrf.mxu0  ;;  %v752_v47 = vpop.f32.mrf.mxu1  ;;  %v251_v53 = vadd.f32 %v713_v49, %v678_v50 }
 0x21e   :  { %v715_v46 = vpop.f32.mrf.mxu0  ;;  %v753_v51 = vpop.f32.mrf.mxu1  ;;  %v326_v57 = vadd.f32 %v751_v36, %v251_v53 }
 0x21f   :  { %v716_v48 = vadd.f32 %v715_v46, %v714_v44  ;;  %v754_v54 = vadd.f32 %v753_v51, %v752_v47 }
 0x221   :  { %v256_v52 = vadd.f32 %v716_v48, %v678_v50 }
 0x223   :  { %v331_v55 = vadd.f32 %v754_v54, %v256_v52 }
 0x238   :  { %v807_v56 = vpop.f32.mrf.mxu0 }
 0x239   :  { %v1191_v58 = vadd.f32 %v807_v56, %v331_v55 }
 0x23a   :  { %v400_v59 = vpop.f32.mrf.mxu0 }
 0x23b   :  { %v1193_v60 = vadd.f32 %v400_v59, %v326_v57  ;;  %423 = vrot.lane.b32.xlu1 %v1191_v58, %s832_s1 }
 0x23d   :  { %421 = vrot.lane.b32.xlu0 %v1193_v60, %s832_s1 }
 0x23f   :  { %411 = vrot.lane.b32.xlu1 %v1193_v60, %s833_s26 }
 0x241   :  { %445 = vrot.lane.b32.xlu0 %v1193_v60, %s834_s2 }
 0x243   :  { %413 = vrot.lane.b32.xlu1 %v1191_v58, %s833_s26 }
 0x247   :  { %447 = vrot.lane.b32.xlu1 %v1191_v58, %s834_s2 }
 0x2ad   :  { %v424_v61 = vpop.permute.xlu1 %423 }
 0x2ae   :  { %v428_v62 = vmax.f32 %v1191_v58, %v424_v61 }
 0x2af   :  { %v422_v63 = vpop.permute.xlu0 %421 }
 0x2b0   :  { %v427_v0 = vmax.f32 %v1193_v60, %v422_v63  ;;  %433 = vrot.lane.b32.xlu1 %v428_v62, %s835_s27 }
 0x2b1   :  { %v412_v1 = vpop.permute.xlu1 %411 }
 0x2b2   :  { %vm417_vm0 = vcmp.gt.f32.partialorder %v1193_v60, %v412_v1  ;;  %431 = vrot.lane.b32.xlu0 %v427_v0, %s835_s27 }
 0x2b3   :  { %v419_v3 = vsel %vm417_vm0, 1, %v836_v2  ;;  %v446_v6 = vpop.permute.xlu0 %445 }
 0x2b4   :  { %v451_v8 = vmax.f32 %v427_v0, %v446_v6 }
 0x2b5   :  { %v414_v4 = vpop.permute.xlu1 %413 }
 0x2b6   :  { %vm418_vm1 = vcmp.gt.f32.partialorder %v1191_v58, %v414_v4  ;;  %439 = vrot.lane.b32.xlu0 %v419_v3, %s833_s26 }
 0x2b7   :  { %v420_v5 = vsel %vm418_vm1, 1, %v836_v2 }
 0x2b8   :  { %441 = vrot.lane.b32.xlu1 %v420_v5, %s833_s26 }
 0x2b9   :  { %v448_v7 = vpop.permute.xlu1 %447 }
 0x2ba   :  { %469 = vrot.lane.b32.xlu0 %v1193_v60, %s837_s28  ;;  %v452_v9 = vmax.f32 %v428_v62, %v448_v7 }
 0x2bc   :  { %471 = vrot.lane.b32.xlu1 %v1191_v58, %s837_s28 }
 0x2be   :  { %455 = vrot.lane.b32.xlu0 %v451_v8, %s838_s29 }
 0x2c0   :  { %457 = vrot.lane.b32.xlu1 %v452_v9, %s838_s29 }
 0x322   :  { %v434_v11 = vpop.permute.xlu1 %433 }
 0x323   :  { %vm438_vm3 = vcmp.gt.f32.partialorder %v1191_v58, %v434_v11 }
 0x324   :  { %v432_v10 = vpop.permute.xlu0 %431 }
 0x325   :  { %vm437_vm2 = vcmp.gt.f32.partialorder %v1193_v60, %v432_v10 }
 0x328   :  { %v440_v12 = vpop.permute.xlu0 %439 }
 0x329   :  { %v443_v13 = vsel %vm437_vm2, 2, %v440_v12 }
 0x32a   :  { %463 = vrot.lane.b32.xlu0 %v443_v13, %s833_s26  ;;  %v442_v14 = vpop.permute.xlu1 %441 }
 0x32b   :  { %v444_v15 = vsel %vm438_vm3, 2, %v442_v14 }
 0x32c   :  { %465 = vrot.lane.b32.xlu1 %v444_v15, %s833_s26  ;;  %v470_v16 = vpop.permute.xlu0 %469 }
 0x32d   :  { %v475_v18 = vmax.f32 %v451_v8, %v470_v16 }
 0x32e   :  { %493 = vrot.lane.b32.xlu0 %v1193_v60, %s839_s30  ;;  %v472_v17 = vpop.permute.xlu1 %471 }
 0x32f   :  { %v476_v19 = vmax.f32 %v452_v9, %v472_v17 }
 0x330   :  { %495 = vrot.lane.b32.xlu1 %v1191_v58, %s839_s30  ;;  %v456_v23 = vpop.permute.xlu0 %455 }
 0x331   :  { %vm461_vm4 = vcmp.gt.f32.partialorder %v1193_v60, %v456_v23 }
 0x332   :  { %479 = vrot.lane.b32.xlu0 %v475_v18, %s840_s4  ;;  %v458_v21 = vpop.permute.xlu1 %457 }
 0x333   :  { %vm462_vm5 = vcmp.gt.f32.partialorder %v1191_v58, %v458_v21 }
 0x334   :  { %481 = vrot.lane.b32.xlu1 %v476_v19, %s840_s4 }
 0x39c   :  { %v464_v20 = vpop.permute.xlu0 %463 }
 0x39d   :  { %v467_v22 = vsel %vm461_vm4, 3, %v464_v20 }
 0x39e   :  { %487 = vrot.lane.b32.xlu0 %v467_v22, %s833_s26  ;;  %v466_v24 = vpop.permute.xlu1 %465 }
 0x39f   :  { %v468_v25 = vsel %vm462_vm5, 3, %v466_v24 }
 0x3a0   :  { %489 = vrot.lane.b32.xlu1 %v468_v25, %s833_s26  ;;  %v494_v32 = vpop.permute.xlu0 %493 }
 0x3a1   :  { %v499_v33 = vmax.f32 %v475_v18, %v494_v32 }
 0x3a2   :  { %517 = vrot.lane.b32.xlu0 %v1193_v60, %s841_s0  ;;  %v496_v31 = vpop.permute.xlu1 %495 }
 0x3a3   :  { %v500_v28 = vmax.f32 %v476_v19, %v496_v31 }
 0x3a4   :  { %519 = vrot.lane.b32.xlu1 %v1191_v58, %s841_s0  ;;  %v480_v35 = vpop.permute.xlu0 %479 }
 0x3a5   :  { %vm485_vm6 = vcmp.gt.f32.partialorder %v1193_v60, %v480_v35 }
 0x3a6   :  { %503 = vrot.lane.b32.xlu0 %v499_v33, %s842_s5  ;;  %v482_v26 = vpop.permute.xlu1 %481 }
 0x3a7   :  { %vm486_vm7 = vcmp.gt.f32.partialorder %v1191_v58, %v482_v26 }
 0x3a8   :  { %505 = vrot.lane.b32.xlu1 %v500_v28, %s842_s5 }
 0x410   :  { %v488_v27 = vpop.permute.xlu0 %487 }
 0x411   :  { %v491_v29 = vsel %vm485_vm6, 4, %v488_v27  ;;  %vm671_vm6 = vcmask 64512  }
 0x412   :  { %511 = vrot.lane.b32.xlu0 %v491_v29, %s833_s26  ;;  %v490_v30 = vpop.permute.xlu1 %489 }
 0x413   :  { %v492_v34 = vsel %vm486_vm7, 4, %v490_v30 }
 0x414   :  { %513 = vrot.lane.b32.xlu1 %v492_v34, %s833_s26  ;;  %v518_v37 = vpop.permute.xlu0 %517 }
 0x415   :  { %v523_v39 = vmax.f32 %v499_v33, %v518_v37 }
 0x416   :  { %541 = vrot.lane.b32.xlu0 %v1193_v60, %s843_s6  ;;  %v520_v38 = vpop.permute.xlu1 %519 }
 0x417   :  { %v524_v40 = vmax.f32 %v500_v28, %v520_v38 }
 0x418   :  { %543 = vrot.lane.b32.xlu1 %v1191_v58, %s843_s6  ;;  %v504_v41 = vpop.permute.xlu0 %503 }
 0x419   :  { %vm509_vm8 = vcmp.gt.f32.partialorder %v1193_v60, %v504_v41 }
 0x41a   :  { %527 = vrot.lane.b32.xlu0 %v523_v39, %s844_s7  ;;  %v506_v42 = vpop.permute.xlu1 %505 }
 0x41b   :  { %vm510_vm9 = vcmp.gt.f32.partialorder %v1191_v58, %v506_v42 }
 0x41c   :  { %529 = vrot.lane.b32.xlu1 %v524_v40, %s844_s7 }
 0x484   :  { %v512_v43 = vpop.permute.xlu0 %511 }
 0x485   :  { %v515_v44 = vsel %vm509_vm8, 5, %v512_v43 }
 0x486   :  { %535 = vrot.lane.b32.xlu0 %v515_v44, %s833_s26  ;;  %v514_v45 = vpop.permute.xlu1 %513 }
 0x487   :  { %v516_v46 = vsel %vm510_vm9, 5, %v514_v45 }
 0x488   :  { %537 = vrot.lane.b32.xlu1 %v516_v46, %s833_s26  ;;  %v542_v47 = vpop.permute.xlu0 %541 }
 0x489   :  { %v547_v49 = vmax.f32 %v523_v39, %v542_v47 }
 0x48a   :  { %565 = vrot.lane.b32.xlu0 %v1193_v60, %s845_s8  ;;  %v544_v48 = vpop.permute.xlu1 %543 }
 0x48b   :  { %v548_v50 = vmax.f32 %v524_v40, %v544_v48 }
 0x48c   :  { %567 = vrot.lane.b32.xlu1 %v1191_v58, %s845_s8  ;;  %v528_v51 = vpop.permute.xlu0 %527 }
 0x48d   :  { %vm533_vm10 = vcmp.gt.f32.partialorder %v1193_v60, %v528_v51 }
 0x48e   :  { %551 = vrot.lane.b32.xlu0 %v547_v49, %s846_s9  ;;  %v530_v52 = vpop.permute.xlu1 %529 }
 0x48f   :  { %vm534_vm11 = vcmp.gt.f32.partialorder %v1191_v58, %v530_v52 }
 0x490   :  { %553 = vrot.lane.b32.xlu1 %v548_v50, %s846_s9 }
 0x4f8   :  { %v536_v53 = vpop.permute.xlu0 %535 }
 0x4f9   :  { %v539_v54 = vsel %vm533_vm10, 6, %v536_v53 }
 0x4fa   :  { %559 = vrot.lane.b32.xlu0 %v539_v54, %s833_s26  ;;  %v538_v36 = vpop.permute.xlu1 %537 }
 0x4fb   :  { %v540_v55 = vsel %vm534_vm11, 6, %v538_v36 }
 0x4fc   :  { %561 = vrot.lane.b32.xlu1 %v540_v55, %s833_s26  ;;  %v566_v56 = vpop.permute.xlu0 %565 }
 0x4fd   :  { %v571_v59 = vmax.f32 %v547_v49, %v566_v56 }
 0x4fe   :  { %589 = vrot.lane.b32.xlu0 %v1193_v60, %s847_s10  ;;  %v568_v57 = vpop.permute.xlu1 %567 }
 0x4ff   :  { %v572_v61 = vmax.f32 %v548_v50, %v568_v57 }
 0x500   :  { %591 = vrot.lane.b32.xlu1 %v1191_v58, %s847_s10  ;;  %v552_v62 = vpop.permute.xlu0 %551 }
 0x501   :  { %vm557_vm12 = vcmp.gt.f32.partialorder %v1193_v60, %v552_v62 }
 0x502   :  { %575 = vrot.lane.b32.xlu0 %v571_v59, %s847_s10  ;;  %v554_v63 = vpop.permute.xlu1 %553 }
 0x503   :  { %vm558_vm13 = vcmp.gt.f32.partialorder %v1191_v58, %v554_v63 }
 0x504   :  { %577 = vrot.lane.b32.xlu1 %v572_v61, %s847_s10 }
 0x56c   :  { %v560_v0 = vpop.permute.xlu0 %559 }
 0x56d   :  { %v563_v1 = vsel %vm557_vm12, 7, %v560_v0 }
 0x56e   :  { %583 = vrot.lane.b32.xlu0 %v563_v1, %s833_s26  ;;  %v562_v2 = vpop.permute.xlu1 %561 }
 0x56f   :  { %v564_v3 = vsel %vm558_vm13, 7, %v562_v2 }
 0x570   :  { %585 = vrot.lane.b32.xlu1 %v564_v3, %s833_s26  ;;  %v590_v4 = vpop.permute.xlu0 %589 }
 0x571   :  { %v595_v6 = vmax.f32 %v571_v59, %v590_v4 }
 0x572   :  { %613 = vrot.lane.b32.xlu0 %v1193_v60, %s846_s9  ;;  %v592_v5 = vpop.permute.xlu1 %591 }
 0x573   :  { %v596_v7 = vmax.f32 %v572_v61, %v592_v5 }
 0x574   :  { %615 = vrot.lane.b32.xlu1 %v1191_v58, %s846_s9  ;;  %v576_v8 = vpop.permute.xlu0 %575 }
 0x575   :  { %vm581_vm14 = vcmp.gt.f32.partialorder %v1193_v60, %v576_v8 }
 0x576   :  { %599 = vrot.lane.b32.xlu0 %v595_v6, %s845_s8  ;;  %v578_v9 = vpop.permute.xlu1 %577 }
 0x577   :  { %vm582_vm15 = vcmp.gt.f32.partialorder %v1191_v58, %v578_v9 }
 0x578   :  { %601 = vrot.lane.b32.xlu1 %v596_v7, %s845_s8 }
 0x5e0   :  { %v584_v10 = vpop.permute.xlu0 %583 }
 0x5e1   :  { %v587_v11 = vsel %vm581_vm14, 8, %v584_v10 }
 0x5e2   :  { %607 = vrot.lane.b32.xlu0 %v587_v11, %s833_s26  ;;  %v586_v12 = vpop.permute.xlu1 %585 }
 0x5e3   :  { %v588_v13 = vsel %vm582_vm15, 8, %v586_v12 }
 0x5e4   :  { %609 = vrot.lane.b32.xlu1 %v588_v13, %s833_s26  ;;  %v614_v14 = vpop.permute.xlu0 %613 }
 0x5e5   :  { %v619_v16 = vmax.f32 %v595_v6, %v614_v14 }
 0x5e6   :  { %637 = vrot.lane.b32.xlu0 %v1193_v60, %s844_s7  ;;  %v616_v15 = vpop.permute.xlu1 %615 }
 0x5e7   :  { %v620_v17 = vmax.f32 %v596_v7, %v616_v15 }
 0x5e8   :  { %639 = vrot.lane.b32.xlu1 %v1191_v58, %s844_s7  ;;  %v600_v18 = vpop.permute.xlu0 %599 }
 0x5e9   :  { %vm605_vm0 = vcmp.gt.f32.partialorder %v1193_v60, %v600_v18 }
 0x5ea   :  { %623 = vrot.lane.b32.xlu0 %v619_v16, %s843_s6  ;;  %v602_v19 = vpop.permute.xlu1 %601 }
 0x5eb   :  { %vm606_vm1 = vcmp.gt.f32.partialorder %v1191_v58, %v602_v19 }
 0x5ec   :  { %625 = vrot.lane.b32.xlu1 %v620_v17, %s843_s6 }
 0x654   :  { %v608_v23 = vpop.permute.xlu0 %607 }
 0x655   :  { %v611_v21 = vsel %vm605_vm0, 9, %v608_v23 }
 0x656   :  { %631 = vrot.lane.b32.xlu0 %v611_v21, %s833_s26  ;;  %v610_v20 = vpop.permute.xlu1 %609 }
 0x657   :  { %v612_v22 = vsel %vm606_vm1, 9, %v610_v20 }
 0x658   :  { %v638_v24 = vpop.permute.xlu0 %637  ;;  %633 = vrot.lane.b32.xlu1 %v612_v22, %s833_s26 }
 0x659   :  { %v643_v25 = vmax.f32 %v619_v16, %v638_v24 }
 0x65a   :  { %v640_v32 = vpop.permute.xlu1 %639 }
 0x65b   :  { %v644_v31 = vmax.f32 %v620_v17, %v640_v32  ;;  %647 = vrot.lane.b32.xlu0 %v643_v25, %s841_s0 }
 0x65c   :  { %v624_v33 = vpop.permute.xlu0 %623 }
 0x65d   :  { %649 = vrot.lane.b32.xlu1 %v644_v31, %s841_s0  ;;  %vm629_vm2 = vcmp.gt.f32.partialorder %v1193_v60, %v624_v33 }
 0x65e   :  { %v626_v28 = vpop.permute.xlu1 %625 }
 0x65f   :  { %vm630_vm3 = vcmp.gt.f32.partialorder %v1191_v58, %v626_v28 }
 0x6c8   :  { %v632_v35 = vpop.permute.xlu0 %631 }
 0x6c9   :  { %v635_v26 = vsel %vm629_vm2, 10, %v632_v35 }
 0x6ca   :  { %655 = vrot.lane.b32.xlu0 %v635_v26, %s833_s26  ;;  %v634_v27 = vpop.permute.xlu1 %633 }
 0x6cb   :  { %v636_v29 = vsel %vm630_vm3, 10, %v634_v27 }
 0x6cc   :  { %657 = vrot.lane.b32.xlu1 %v636_v29, %s833_s26 }
 0x6cd   :  { %v648_v30 = vpop.permute.xlu0 %647 }
 0x6ce   :  { %vm653_vm4 = vcmp.gt.f32.partialorder %v1193_v60, %v648_v30 }
 0x6cf   :  { %v650_v34 = vpop.permute.xlu1 %649 }
 0x6d0   :  { %vm654_vm5 = vcmp.gt.f32.partialorder %v1191_v58, %v650_v34 }
 0x73c   :  { %v656_v37 = vpop.permute.xlu0 %655 }
 0x73d   :  { %v659_v38 = vsel %vm653_vm4, 11, %v656_v37 }
 0x73e   :  { %v661_v39 = vcvt.s32.f32 %v659_v38  ;;  %v658_v40 = vpop.permute.xlu1 %657 }
 0x73f   :  { %v660_v41 = vsel %vm654_vm5, 11, %v658_v40 }
 0x740   :  { %v662_v42 = vcvt.s32.f32 %v660_v41  ;;  %665 = vrot.lane.b32.xlu0 %v661_v39, %s842_s5 }
 0x742   :  { %667 = vrot.lane.b32.xlu1 %v662_v42, %s842_s5 }
 0x7b2   :  { %v666_v43 = vpop.permute.xlu0 %665 }
 0x7b3   :  { %672 = vst.msk [vmem:[%s1296_s3] sm:$0xff] %vm671_vm6, %v666_v43 }
 0x7b4   :  { %v668_v44 = vpop.permute.xlu1 %667 }
 0x7b5   :  { %673 = vst.msk [vmem:[%s1296_s3 + $0x8] sm:$0xff] %vm671_vm6, %v668_v44 }

</bundles_post_ra>
